<compile_context>
chip_gen: v6e
topology: v6e:2x2x1
jax: 0.10.0
libtpu: 0.0.40
codegen_flags: <defaults>
</compile_context>

<pallas_src>
import functools

import jax
import jax.numpy as jnp
from jax import lax
from jax.experimental import pallas as pl
from jax.experimental.pallas import tpu as pltpu


# ------------------------------ fused kernel --------------------------------

def _fused_conv_maxpool_kernel(x_ref, w_ref, b_ref, o_ref, *, sh, sw, nsp):
    """Fused Conv3d(2,2,2)/s1 + MaxPool3d(2,2,2)/s2 for one batch element.

    x_ref: (Cin, NSP)          channels on sublanes, flattened (h,w,d) on lanes
    w_ref: (8, Cout_pad, Cin)  conv weights, window-offset-major (j,i,k)
    b_ref: (Cout_pad, 1)       bias (padded with zeros)
    o_ref: (Cout_pad, NSP)     lane-dense output; only even (h,w,d) base columns
                               are meaningful (wrapper slices them out)
    sh = W*D (h stride), sw = D (w stride), nsp = H*W*D
    """

    def shift(v, s):
        # shifted[f] = v[(f + s) mod nsp]; wraparound only touches columns the
        # wrapper discards (right-edge h/w/d positions).
        if s == 0:
            return v
        return pltpu.roll(v, shift=nsp - s, axis=1)

    x0 = x_ref[...]
    x_k = shift(x0, 1)        # (j,i,k) = (0,0,1)
    x_i = shift(x0, sw)       # (0,1,0)
    x_ik = shift(x_k, sw)     # (0,1,1)
    x_j = shift(x0, sh)       # (1,0,0)
    x_jk = shift(x_k, sh)     # (1,0,1)
    x_ji = shift(x_i, sh)     # (1,1,0)
    x_jik = shift(x_ik, sh)   # (1,1,1)
    shifted = (x0, x_k, x_i, x_ik, x_j, x_jk, x_ji, x_jik)  # o = j*4 + i*2 + k

    # Conv = accumulation of 8 shifted matmuls on the MXU, f32 accumulation.
    acc = jnp.dot(w_ref[0], shifted[0], preferred_element_type=jnp.float32)
    for o in range(1, 8):
        acc = acc + jnp.dot(w_ref[o], shifted[o],
                            preferred_element_type=jnp.float32)

    # 2x2x2 / stride-2 max pool as a separable element-wise max tree (VPU only).
    m = jnp.maximum(acc, shift(acc, 1))
    m = jnp.maximum(m, shift(m, sw))
    m = jnp.maximum(m, shift(m, sh))

    # Bias is constant per channel, so it commutes with max; add in the epilogue.
    o_ref[...] = m + b_ref[...]


# --------------------------------- wrapper -----------------------------------

def model1_forward(x, conv_w, conv_b):
    """x: (B, Cin, H, W, D); conv_w: (Cout, Cin, 2, 2, 2); conv_b: (Cout,)."""
    B, Cin, H, W, D = x.shape
    Cout, Cin_w, kh, kw, kd = conv_w.shape
    assert (Cin_w, kh, kw, kd) == (Cin, 2, 2, 2)

    NSP = H * W * D                      # 512: multiple of 128 -> lane dense
    KWIN = kh * kw * kd                  # 8
    COUT_PAD = 8                         # pad 5 -> 8 sublanes

    # Conv / pool output spatial dims (valid padding, pool kernel 2 stride 2).
    Hc, Wc, Dc = H - kh + 1, W - kw + 1, D - kd + 1
    Hp, Wp, Dp = (Hc - 2) // 2 + 1, (Wc - 2) // 2 + 1, (Dc - 2) // 2 + 1

    # Minimal glue: flatten spatial (no transpose of x), repack weights
    # offset-major and pad Cout to 8.
    x2 = x.reshape(B, Cin, NSP)
    w_r = jnp.transpose(conv_w, (2, 3, 4, 0, 1)).reshape(KWIN, Cout, Cin)
    w_r = jnp.pad(w_r, ((0, 0), (0, COUT_PAD - Cout), (0, 0)))
    b_r = jnp.pad(conv_b, (0, COUT_PAD - Cout)).reshape(COUT_PAD, 1)

    kernel = functools.partial(
        _fused_conv_maxpool_kernel, sh=W * D, sw=D, nsp=NSP)

    flops = 2 * B * NSP * (Cin * KWIN) * COUT_PAD + 3 * B * NSP * COUT_PAD
    bytes_accessed = 4 * (x2.size + w_r.size + b_r.size + B * COUT_PAD * NSP)

    out = pl.pallas_call(
        kernel,
        grid=(B,),
        in_specs=[
            pl.BlockSpec((None, Cin, NSP), lambda b: (b, 0, 0)),
            pl.BlockSpec((KWIN, COUT_PAD, Cin), lambda b: (0, 0, 0)),
            pl.BlockSpec((COUT_PAD, 1), lambda b: (0, 0)),
        ],
        out_specs=pl.BlockSpec((None, COUT_PAD, NSP), lambda b: (b, 0, 0)),
        out_shape=jax.ShapeDtypeStruct((B, COUT_PAD, NSP), jnp.float32),
        compiler_params=pltpu.CompilerParams(
            dimension_semantics=("parallel",)),
        cost_estimate=pl.CostEstimate(
            flops=flops, transcendentals=0, bytes_accessed=bytes_accessed),
    )(x2, w_r, b_r)

    # Tiny glue on the small result: keep real channels and even base positions.
    out = out.reshape(B, COUT_PAD, H, W, D)
    out = out[:, :Cout, 0:2 * Hp:2, 0:2 * Wp:2, 0:2 * Dp:2]
    return out


# ----------------------------------- main ------------------------------------

if __name__ == "__main__":
    key = jax.random.PRNGKey(0)
    k_x, k_w, k_b = jax.random.split(key, 3)

    B, Cin, H, W, D = 2, 4, 8, 8, 8
    Cout, kh, kw, kd = 5, 2, 2, 2

    x = jax.random.normal(k_x, (B, Cin, H, W, D), dtype=jnp.float32)

    # Deterministic Conv3d params (PyTorch-style uniform(-1/sqrt(fan_in), ...)).
    fan_in = Cin * kh * kw * kd
    bound = 1.0 / (fan_in ** 0.5)
    conv_w = jax.random.uniform(
        k_w, (Cout, Cin, kh, kw, kd), minval=-bound, maxval=bound,
        dtype=jnp.float32)
    conv_b = jax.random.uniform(
        k_b, (Cout,), minval=-bound, maxval=bound, dtype=jnp.float32)

    out = jax.jit(model1_forward)(x, conv_w, conv_b)
    out = jax.block_until_ready(out)

    # Pure-JAX reference (conv + reduce_window max-pool).
    ref_conv = lax.conv_general_dilated(
        x, conv_w, window_strides=(1, 1, 1), padding="VALID",
        dimension_numbers=("NCDHW", "OIDHW", "NCDHW"),
    ) + conv_b[None, :, None, None, None]
    ref_out = lax.reduce_window(
        ref_conv, -jnp.inf, lax.max,
        window_dimensions=(1, 1, 2, 2, 2),
        window_strides=(1, 1, 2, 2, 2),
        padding="VALID",
    )
    assert out.shape == (B, Cout, 3, 3, 3), out.shape
    assert jnp.allclose(out, ref_out, atol=1e-4, rtol=1e-4), "mismatch vs reference"

    print("KERNEL_OK")
</pallas_src>

<mosaic_0001>
module attributes {stable_mosaic.version = 11 : i64} {
  func.func @_fused_conv_maxpool_kernel(%arg0: i32, %arg1: memref<1x4x512xf32, #tpu.memory_space<vmem>>, %arg2: memref<8x8x4xf32, #tpu.memory_space<vmem>>, %arg3: memref<8x1xf32, #tpu.memory_space<vmem>>, %arg4: memref<1x8x512xf32, #tpu.memory_space<vmem>>) attributes {dimension_semantics = [#tpu.dimension_semantics<parallel>], iteration_bounds = array<i64: 2>, scalar_prefetch = 0 : i64, scratch_operands = 0 : i64, tpu.core_type = #tpu.core_type<tc>, window_params = [{transform_indices = @transform_0, window_bounds = array<i64: 1, 4, 512>}, {pipeline_mode = #tpu.pipeline_mode<synchronous>, transform_indices = @transform_1, window_bounds = array<i64: 8, 8, 4>}, {pipeline_mode = #tpu.pipeline_mode<synchronous>, transform_indices = @transform_2, window_bounds = array<i64: 8, 1>}, {transform_indices = @transform_3, window_bounds = array<i64: 1, 8, 512>}]} {
    %c0 = arith.constant 0 : index
    %c0_0 = arith.constant 0 : index
    %c0_1 = arith.constant 0 : index
    %0 = vector.load %arg1[%c0, %c0_0, %c0_1] : memref<1x4x512xf32, #tpu.memory_space<vmem>>, vector<1x4x512xf32>
    %1 = vector.shape_cast %0 : vector<1x4x512xf32> to vector<4x512xf32>
    %c511_i32 = arith.constant 511 : i32
    %2 = tpu.dynamic_rotate %1 by %c511_i32 dim 1 : vector<4x512xf32>, i32 -> vector<4x512xf32>
    %c504_i32 = arith.constant 504 : i32
    %3 = tpu.dynamic_rotate %1 by %c504_i32 dim 1 : vector<4x512xf32>, i32 -> vector<4x512xf32>
    %c504_i32_2 = arith.constant 504 : i32
    %4 = tpu.dynamic_rotate %2 by %c504_i32_2 dim 1 : vector<4x512xf32>, i32 -> vector<4x512xf32>
    %c448_i32 = arith.constant 448 : i32
    %5 = tpu.dynamic_rotate %1 by %c448_i32 dim 1 : vector<4x512xf32>, i32 -> vector<4x512xf32>
    %c448_i32_3 = arith.constant 448 : i32
    %6 = tpu.dynamic_rotate %2 by %c448_i32_3 dim 1 : vector<4x512xf32>, i32 -> vector<4x512xf32>
    %c448_i32_4 = arith.constant 448 : i32
    %7 = tpu.dynamic_rotate %3 by %c448_i32_4 dim 1 : vector<4x512xf32>, i32 -> vector<4x512xf32>
    %c448_i32_5 = arith.constant 448 : i32
    %8 = tpu.dynamic_rotate %4 by %c448_i32_5 dim 1 : vector<4x512xf32>, i32 -> vector<4x512xf32>
    %c0_6 = arith.constant 0 : index
    %c0_7 = arith.constant 0 : index
    %c0_8 = arith.constant 0 : index
    %9 = vector.load %arg2[%c0_6, %c0_7, %c0_8] : memref<8x8x4xf32, #tpu.memory_space<vmem>>, vector<1x8x4xf32>
    %10 = vector.shape_cast %9 : vector<1x8x4xf32> to vector<8x4xf32>
    %cst = arith.constant dense<0.000000e+00> : vector<8x512xf32>
    %11 = tpu.matmul %10, %1, %cst {dimension_numbers = #tpu.dot_dimension_numbers<[1], [0], [0], [1], [0, 0, 1, 1], [], []>} : vector<8x4xf32>, vector<4x512xf32>, vector<8x512xf32> -> vector<8x512xf32>
    %c1 = arith.constant 1 : index
    %c0_9 = arith.constant 0 : index
    %c0_10 = arith.constant 0 : index
    %12 = vector.load %arg2[%c1, %c0_9, %c0_10] : memref<8x8x4xf32, #tpu.memory_space<vmem>>, vector<1x8x4xf32>
    %13 = vector.shape_cast %12 : vector<1x8x4xf32> to vector<8x4xf32>
    %cst_11 = arith.constant dense<0.000000e+00> : vector<8x512xf32>
    %14 = tpu.matmul %13, %2, %cst_11 {dimension_numbers = #tpu.dot_dimension_numbers<[1], [0], [0], [1], [0, 0, 1, 1], [], []>} : vector<8x4xf32>, vector<4x512xf32>, vector<8x512xf32> -> vector<8x512xf32>
    %15 = arith.addf %11, %14 : vector<8x512xf32>
    %c2 = arith.constant 2 : index
    %c0_12 = arith.constant 0 : index
    %c0_13 = arith.constant 0 : index
    %16 = vector.load %arg2[%c2, %c0_12, %c0_13] : memref<8x8x4xf32, #tpu.memory_space<vmem>>, vector<1x8x4xf32>
    %17 = vector.shape_cast %16 : vector<1x8x4xf32> to vector<8x4xf32>
    %cst_14 = arith.constant dense<0.000000e+00> : vector<8x512xf32>
    %18 = tpu.matmul %17, %3, %cst_14 {dimension_numbers = #tpu.dot_dimension_numbers<[1], [0], [0], [1], [0, 0, 1, 1], [], []>} : vector<8x4xf32>, vector<4x512xf32>, vector<8x512xf32> -> vector<8x512xf32>
    %19 = arith.addf %15, %18 : vector<8x512xf32>
    %c3 = arith.constant 3 : index
    %c0_15 = arith.constant 0 : index
    %c0_16 = arith.constant 0 : index
    %20 = vector.load %arg2[%c3, %c0_15, %c0_16] : memref<8x8x4xf32, #tpu.memory_space<vmem>>, vector<1x8x4xf32>
    %21 = vector.shape_cast %20 : vector<1x8x4xf32> to vector<8x4xf32>
    %cst_17 = arith.constant dense<0.000000e+00> : vector<8x512xf32>
    %22 = tpu.matmul %21, %4, %cst_17 {dimension_numbers = #tpu.dot_dimension_numbers<[1], [0], [0], [1], [0, 0, 1, 1], [], []>} : vector<8x4xf32>, vector<4x512xf32>, vector<8x512xf32> -> vector<8x512xf32>
    %23 = arith.addf %19, %22 : vector<8x512xf32>
    %c4 = arith.constant 4 : index
    %c0_18 = arith.constant 0 : index
    %c0_19 = arith.constant 0 : index
    %24 = vector.load %arg2[%c4, %c0_18, %c0_19] : memref<8x8x4xf32, #tpu.memory_space<vmem>>, vector<1x8x4xf32>
    %25 = vector.shape_cast %24 : vector<1x8x4xf32> to vector<8x4xf32>
    %cst_20 = arith.constant dense<0.000000e+00> : vector<8x512xf32>
    %26 = tpu.matmul %25, %5, %cst_20 {dimension_numbers = #tpu.dot_dimension_numbers<[1], [0], [0], [1], [0, 0, 1, 1], [], []>} : vector<8x4xf32>, vector<4x512xf32>, vector<8x512xf32> -> vector<8x512xf32>
    %27 = arith.addf %23, %26 : vector<8x512xf32>
    %c5 = arith.constant 5 : index
    %c0_21 = arith.constant 0 : index
    %c0_22 = arith.constant 0 : index
    %28 = vector.load %arg2[%c5, %c0_21, %c0_22] : memref<8x8x4xf32, #tpu.memory_space<vmem>>, vector<1x8x4xf32>
    %29 = vector.shape_cast %28 : vector<1x8x4xf32> to vector<8x4xf32>
    %cst_23 = arith.constant dense<0.000000e+00> : vector<8x512xf32>
    %30 = tpu.matmul %29, %6, %cst_23 {dimension_numbers = #tpu.dot_dimension_numbers<[1], [0], [0], [1], [0, 0, 1, 1], [], []>} : vector<8x4xf32>, vector<4x512xf32>, vector<8x512xf32> -> vector<8x512xf32>
    %31 = arith.addf %27, %30 : vector<8x512xf32>
    %c6 = arith.constant 6 : index
    %c0_24 = arith.constant 0 : index
    %c0_25 = arith.constant 0 : index
    %32 = vector.load %arg2[%c6, %c0_24, %c0_25] : memref<8x8x4xf32, #tpu.memory_space<vmem>>, vector<1x8x4xf32>
    %33 = vector.shape_cast %32 : vector<1x8x4xf32> to vector<8x4xf32>
    %cst_26 = arith.constant dense<0.000000e+00> : vector<8x512xf32>
    %34 = tpu.matmul %33, %7, %cst_26 {dimension_numbers = #tpu.dot_dimension_numbers<[1], [0], [0], [1], [0, 0, 1, 1], [], []>} : vector<8x4xf32>, vector<4x512xf32>, vector<8x512xf32> -> vector<8x512xf32>
    %35 = arith.addf %31, %34 : vector<8x512xf32>
    %c7 = arith.constant 7 : index
    %c0_27 = arith.constant 0 : index
    %c0_28 = arith.constant 0 : index
    %36 = vector.load %arg2[%c7, %c0_27, %c0_28] : memref<8x8x4xf32, #tpu.memory_space<vmem>>, vector<1x8x4xf32>
    %37 = vector.shape_cast %36 : vector<1x8x4xf32> to vector<8x4xf32>
    %cst_29 = arith.constant dense<0.000000e+00> : vector<8x512xf32>
    %38 = tpu.matmul %37, %8, %cst_29 {dimension_numbers = #tpu.dot_dimension_numbers<[1], [0], [0], [1], [0, 0, 1, 1], [], []>} : vector<8x4xf32>, vector<4x512xf32>, vector<8x512xf32> -> vector<8x512xf32>
    %39 = arith.addf %35, %38 : vector<8x512xf32>
    %c511_i32_30 = arith.constant 511 : i32
    %40 = tpu.dynamic_rotate %39 by %c511_i32_30 dim 1 : vector<8x512xf32>, i32 -> vector<8x512xf32>
    %41 = arith.maximumf %39, %40 : vector<8x512xf32>
    %c504_i32_31 = arith.constant 504 : i32
    %42 = tpu.dynamic_rotate %41 by %c504_i32_31 dim 1 : vector<8x512xf32>, i32 -> vector<8x512xf32>
    %43 = arith.maximumf %41, %42 : vector<8x512xf32>
    %c448_i32_32 = arith.constant 448 : i32
    %44 = tpu.dynamic_rotate %43 by %c448_i32_32 dim 1 : vector<8x512xf32>, i32 -> vector<8x512xf32>
    %45 = arith.maximumf %43, %44 : vector<8x512xf32>
    %c0_33 = arith.constant 0 : index
    %c0_34 = arith.constant 0 : index
    %46 = vector.load %arg3[%c0_33, %c0_34] : memref<8x1xf32, #tpu.memory_space<vmem>>, vector<8x1xf32>
    %47 = vector.broadcast %46 : vector<8x1xf32> to vector<8x512xf32>
    %48 = arith.addf %45, %47 : vector<8x512xf32>
    %c0_35 = arith.constant 0 : index
    %c0_36 = arith.constant 0 : index
    %c0_37 = arith.constant 0 : index
    %49 = vector.load %arg4[%c0_35, %c0_36, %c0_37] : memref<1x8x512xf32, #tpu.memory_space<vmem>>, vector<1x8x512xf32>
    %50 = vector.shape_cast %49 : vector<1x8x512xf32> to vector<8x512xf32>
    %51 = vector.shape_cast %48 : vector<8x512xf32> to vector<1x8x512xf32>
    tpu.vector_store %arg4[%c0_35, %c0_36, %c0_37], %51 {strides = array<i32>} : memref<1x8x512xf32, #tpu.memory_space<vmem>>, vector<1x8x512xf32>,
    return
  }
  func.func @transform_0(%arg0: i32) -> (i32, i32, i32) {
    %c0_i32 = arith.constant 0 : i32
    %c0_i32_0 = arith.constant 0 : i32
    %c0_i32_1 = arith.constant 0 : i32
    return %arg0, %c0_i32, %c0_i32_0 : i32, i32, i32
  }
  func.func @transform_1(%arg0: i32) -> (i32, i32, i32) {
    %c0_i32 = arith.constant 0 : i32
    %c0_i32_0 = arith.constant 0 : i32
    %c0_i32_1 = arith.constant 0 : i32
    %c0_i32_2 = arith.constant 0 : i32
    return %c0_i32, %c0_i32_0, %c0_i32_1 : i32, i32, i32
  }
  func.func @transform_2(%arg0: i32) -> (i32, i32) {
    %c0_i32 = arith.constant 0 : i32
    %c0_i32_0 = arith.constant 0 : i32
    %c0_i32_1 = arith.constant 0 : i32
    return %c0_i32, %c0_i32_0 : i32, i32
  }
  func.func @transform_3(%arg0: i32) -> (i32, i32, i32) {
    %c0_i32 = arith.constant 0 : i32
    %c0_i32_0 = arith.constant 0 : i32
    %c0_i32_1 = arith.constant 0 : i32
    return %arg0, %c0_i32, %c0_i32_0 : i32, i32, i32
  }
}

</mosaic_0001>

<bundles_post_ra>
// kernel: model1_forward.1
= control target key start
LH: loop header
LB: loop body
LE: loop exit
PB: predicated region body
PF: predicated region fallthrough
CT: control target
= control target key end

     0   :  { %s1795_s12 = smov 0   ;;  %s2046_s0 = inlined_call_operand.vmem [shape: f32[2,4,512], index: 0, kind: input, shape index: {}]   ;;  %s2047_s1 = inlined_call_operand.vmem [shape: f32[8,8,4], index: 1, kind: input, shape index: {}]   ;;  %s2048_s2 = inlined_call_operand.vmem [shape: f32[8,1], index: 2, kind: input, shape index: {}]   ;;  %s2049_s3 = inlined_call_operand.vmem [shape: f32[2,8,512], index: 3, kind: output, shape index: {}]  }
   0x1 LB: > { %s1678_s13 = sadd.s32 4294967295, %s1768_s12   ;;  %p1682_p0 = scmp.ge.s32.totalorder %s1768_s12, 1  ;;  %s1768_s12 = sphi %s1795_s12, %s13_s12  }
   0x2   : > { %p137_p1 = scmp.lt.s32.totalorder %s1768_s12, 3 }
   0x4   : > { %p138_p2 = pnand %p1682_p0, %p137_p1 }
   0x5   : > { %p161_p3 = scmp.lt.s32.totalorder (!%p138_p2), %s1678_s13, 1  ;;  %s1770_s18 = smov (!%p138_p2), 127  }
   0x6   : > { %141 = sbr.rel (%p138_p2) target bundleno = 938 (0x3aa), region = 32  ;;  %s1771_s19 = smov (!%p138_p2), 120  }
   0x7   : > { %s1773_s24 = smov (!%p138_p2), 64  }
   0xb   : > { %s2051_s13 = smov (!%p161_p3, %s1678_s13), 1  ;;  %v1772_v4 = vmov 0.0   ;;  %v187_v5 = vlaneseq  ;;  %vm275_vm1 = vcmask 1043456   ;;  %v1687_v15 = vld [vmem:[%s2047_s1 + $0x8] sm:$0xff]  ;;  %vm271_vm2 = vcmask 31744   ;;  %v268_v18 = vld [vmem:[%s2047_s1] sm:$0xff] }
   0xc   : > { %s1744_s14 = sshll.u32 %s2051_s13, 4  ;;  %352 = vmatprep.mubr.f32.mxu0 %v1772_v4  ;;  %423 = vmatprep.mubr.f32.mxu1 %v1772_v4  ;;  %v1700_v25 = vld [vmem:[%s2047_s1 + $0x10] sm:$0xff]  ;;  %v1707_v34 = vld [vmem:[%s2047_s1 + $0x18] sm:$0xff]  ;;  %v1714_v41 = vld [vmem:[%s2047_s1 + $0x20] sm:$0xff] }
   0xd   : > { %s165_s17 = scalar_lea.vmem %s2046_s0, %s1744_s14  ;;  %v1829_v6 = vand.u32 127, %v187_v5  ;;  %v1721_v49 = vld [vmem:[%s2047_s1 + $0x28] sm:$0xff]  ;;  %v1728_v59 = vld [vmem:[%s2047_s1 + $0x30] sm:$0xff]  ;;  %s1745_s14 = sshll.u32 %s2051_s13, 5 }
   0xe   : > { %v1809_v0 = vld [vmem:[%s165_s17 + $0x8] sm:$0xff]  ;;  %v171_v1 = vld [vmem:[%s165_s17] sm:$0xff]  ;;  %s170_s17 = scalar_lea.vmem %s2049_s3, %s1745_s14 }
   0xf   : > { %183 = vrot.lane.b32.xlu1 %v1809_v0, %s1770_s18  ;;  %179 = vrot.lane.b32.xlu0 %v171_v1, %s1770_s18  ;;  %v1816_v2 = vcombine.high %v1809_v0, %v1809_v0  ;;  %v175_v3 = vcombine.high %v171_v1, %v171_v1  ;;  %vm189_vm0 = vcmp.lt.s32.totalorder %v1829_v6, 127  ;;  %vm202_vm3 = vcmp.lt.s32.totalorder %v1829_v6, 120 }
  0x10   : > { %vm227_vm4 = vcmp.lt.s32.totalorder %v1829_v6, 64 }
  0x13   : > { %185 = vrot.lane.b32.xlu1 %v1816_v2, %s1770_s18  ;;  %181 = vrot.lane.b32.xlu0 %v175_v3, %s1770_s18 }
  0x17   : > { %196 = vrot.lane.b32.xlu1 %v175_v3, %s1771_s19  ;;  %194 = vrot.lane.b32.xlu0 %v171_v1, %s1771_s19 }
  0x1b   : > { %200 = vrot.lane.b32.xlu1 %v1816_v2, %s1771_s19  ;;  %198 = vrot.lane.b32.xlu0 %v1809_v0, %s1771_s19 }
  0x81   : > { %v184_v7 = vpop.permute.xlu1 %183  ;;  %v180_v8 = vpop.permute.xlu0 %179 }
  0x85   : > { %v186_v9 = vpop.permute.xlu1 %185  ;;  %v182_v10 = vpop.permute.xlu0 %181 }
  0x86   : > { %v193_v11 = vsel %vm189_vm0, %v186_v9, %v180_v8  ;;  %v192_v12 = vsel %vm189_vm0, %v180_v8, %v182_v10  ;;  %v191_v13 = vsel %vm189_vm0, %v182_v10, %v184_v7  ;;  %v190_v14 = vsel %vm189_vm0, %v184_v7, %v186_v9 }
  0x87   : > { %1691 = vmatprep.subr.msk.mxu1 %vm275_vm1, %v193_v11  ;;  %207 = vrot.lane.b32.xlu0 %v192_v12, %s1771_s19 }
  0x88   : > { %209 = vrot.lane.b32.xlu1 %v191_v13, %s1771_s19  ;;  %1688 = vmatprep.subr.msk.mxu0 %vm275_vm1, %v191_v13 }
  0x89   : > { %1689 = vmatpush1.msk.msra.mxu0 %vm275_vm1, %v192_v12  ;;  %1692 = vmatpush1.msk.msra.mxu1 %vm275_vm1, %v190_v14  ;;  %v197_v16 = vpop.permute.xlu1 %196  ;;  %v195_v17 = vpop.permute.xlu0 %194 }
  0x8a   : > { %1690 = vmatmul.mubr.msk.f32.vlgmr.msra.gmra.mxu0 %vm271_vm2, %v1687_v15  ;;  %1694 = vmatprep.subr.msk.mxu0 %vm275_vm1, %v175_v3  ;;  %v205_v21 = vsel %vm202_vm3, %v195_v17, %v197_v16 }
  0x8b   : > { %211 = vrot.lane.b32.xlu0 %v190_v14, %s1771_s19  ;;  %1695 = vmatpush1.msk.msra.mxu0 %vm275_vm1, %v171_v1 }
  0x8c   : > { %213 = vrot.lane.b32.xlu1 %v193_v11, %s1771_s19  ;;  %1697 = vmatprep.subr.msk.mxu1 %vm275_vm1, %v1816_v2 }
  0x8d   : > { %v199_v19 = vpop.permute.xlu0 %198  ;;  %1693 = vmatmul.mubr.msk.f32.vlgmr.msra.gmra.mxu1 %vm271_vm2, %v1687_v15  ;;  %505 = vmatprep.mubr.f32.mxu0 %v1772_v4  ;;  %v201_v22 = vpop.permute.xlu1 %200 }
  0x8e   : > { %v204_v20 = vsel %vm202_vm3, %v197_v16, %v199_v19  ;;  %1698 = vmatpush1.msk.msra.mxu1 %vm275_vm1, %v1809_v0  ;;  %1696 = vmatmul.mubr.msk.f32.vlgmr.msra.gmra.mxu0 %vm271_vm2, %v268_v18  ;;  %v206_v23 = vsel %vm202_vm3, %v201_v22, %v195_v17  ;;  %v203_v24 = vsel %vm202_vm3, %v199_v19, %v201_v22 }
  0x8f   : > { %219 = vrot.lane.b32.xlu0 %v171_v1, %s1773_s24  ;;  %1701 = vmatprep.subr.msk.mxu0 %vm275_vm1, %v204_v20 }
  0x90   : > { %221 = vrot.lane.b32.xlu1 %v175_v3, %s1773_s24  ;;  %1702 = vmatpush1.msk.msra.mxu0 %vm275_vm1, %v205_v21  ;;  %v1735_v3 = vld [vmem:[%s2047_s1 + $0x38] sm:$0xff] }
  0x91   : > { %1704 = vmatprep.subr.msk.mxu1 %vm275_vm1, %v206_v23  ;;  %576 = vmatprep.mubr.f32.mxu1 %v1772_v4 }
  0x92   : > { %1699 = vmatmul.mubr.msk.f32.vlgmr.msra.gmra.mxu1 %vm271_vm2, %v268_v18  ;;  %664 = vmatprep.mubr.f32.mxu0 %v1772_v4 }
  0x93   : > { %223 = vrot.lane.b32.xlu0 %v1809_v0, %s1773_s24  ;;  %1705 = vmatpush1.msk.msra.mxu1 %vm275_vm1, %v203_v24 }
  0x94   : > { %225 = vrot.lane.b32.xlu1 %v1816_v2, %s1773_s24  ;;  %735 = vmatprep.mubr.f32.mxu1 %v1772_v4 }
  0x95   : > { %1703 = vmatmul.mubr.msk.f32.vlgmr.msra.gmra.mxu0 %vm271_vm2, %v1700_v25 }
  0x96   : > { %1706 = vmatmul.mubr.msk.f32.vlgmr.msra.gmra.mxu1 %vm271_vm2, %v1700_v25  ;;  %827 = vmatprep.mubr.f32.mxu0 %v1772_v4 }
  0x97   : > { %232 = vrot.lane.b32.xlu0 %v192_v12, %s1773_s24  ;;  %898 = vmatprep.mubr.f32.mxu1 %v1772_v4 }
  0x98   : > { %234 = vrot.lane.b32.xlu1 %v191_v13, %s1773_s24 }
  0x9b   : > { %236 = vrot.lane.b32.xlu0 %v190_v14, %s1773_s24 }
  0x9c   : > { %238 = vrot.lane.b32.xlu1 %v193_v11, %s1773_s24 }
  0x9f   : > { %244 = vrot.lane.b32.xlu0 %v205_v21, %s1773_s24 }
  0xa0   : > { %246 = vrot.lane.b32.xlu1 %v204_v20, %s1773_s24 }
  0xa3   : > { %248 = vrot.lane.b32.xlu0 %v203_v24, %s1773_s24 }
  0xa4   : > { %250 = vrot.lane.b32.xlu1 %v206_v23, %s1773_s24 }
  0xf9   : > { %v208_v26 = vpop.permute.xlu0 %207 }
  0xfa   : > { %v210_v27 = vpop.permute.xlu1 %209 }
  0xfb   : > { %v217_v28 = vsel %vm202_vm3, %v208_v26, %v210_v27 }
  0xfc   : > { %256 = vrot.lane.b32.xlu0 %v217_v28, %s1773_s24 }
  0xfd   : > { %v212_v29 = vpop.permute.xlu0 %211 }
  0xfe   : > { %v214_v30 = vpop.permute.xlu1 %213  ;;  %v216_v31 = vsel %vm202_vm3, %v210_v27, %v212_v29 }
  0xff   : > { %v218_v32 = vsel %vm202_vm3, %v214_v30, %v208_v26  ;;  %258 = vrot.lane.b32.xlu1 %v216_v31, %s1773_s24  ;;  %1708 = vmatprep.subr.msk.mxu0 %vm275_vm1, %v216_v31  ;;  %v215_v33 = vsel %vm202_vm3, %v212_v29, %v214_v30 }
 0x100   : > { %1711 = vmatprep.subr.msk.mxu1 %vm275_vm1, %v218_v32  ;;  %260 = vrot.lane.b32.xlu0 %v215_v33, %s1773_s24 }
 0x101   : > { %1709 = vmatpush1.msk.msra.mxu0 %vm275_vm1, %v217_v28  ;;  %1712 = vmatpush1.msk.msra.mxu1 %vm275_vm1, %v215_v33  ;;  %v220_v35 = vpop.permute.xlu0 %219 }
 0x102   : > { %v222_v36 = vpop.permute.xlu1 %221  ;;  %1710 = vmatmul.mubr.msk.f32.vlgmr.msra.gmra.mxu0 %vm271_vm2, %v1707_v34  ;;  %1713 = vmatmul.mubr.msk.f32.vlgmr.msra.gmra.mxu1 %vm271_vm2, %v1707_v34 }
 0x103   : > { %262 = vrot.lane.b32.xlu1 %v218_v32, %s1773_s24  ;;  %990 = vmatprep.mubr.f32.mxu0 %v1772_v4  ;;  %v230_v37 = vsel %vm227_vm4, %v220_v35, %v222_v36 }
 0x104   : > { %1061 = vmatprep.mubr.f32.mxu1 %v1772_v4 }
 0x105   : > { %v224_v38 = vpop.permute.xlu0 %223 }
 0x106   : > { %v226_v39 = vpop.permute.xlu1 %225  ;;  %v229_v40 = vsel %vm227_vm4, %v222_v36, %v224_v38 }
 0x107   : > { %v231_v42 = vsel %vm227_vm4, %v226_v39, %v220_v35  ;;  %v228_v43 = vsel %vm227_vm4, %v224_v38, %v226_v39  ;;  %1715 = vmatprep.subr.msk.mxu0 %vm275_vm1, %v229_v40 }
 0x108   : > { %1718 = vmatprep.subr.msk.mxu1 %vm275_vm1, %v231_v42  ;;  %1716 = vmatpush1.msk.msra.mxu0 %vm275_vm1, %v230_v37 }
 0x109   : > { %v233_v44 = vpop.permute.xlu0 %232  ;;  %1719 = vmatpush1.msk.msra.mxu1 %vm275_vm1, %v228_v43  ;;  %1717 = vmatmul.mubr.msk.f32.vlgmr.msra.gmra.mxu0 %vm271_vm2, %v1714_v41 }
 0x10a   : > { %v235_v45 = vpop.permute.xlu1 %234  ;;  %1720 = vmatmul.mubr.msk.f32.vlgmr.msra.gmra.mxu1 %vm271_vm2, %v1714_v41  ;;  %1153 = vmatprep.mubr.f32.mxu0 %v1772_v4 }
 0x10b   : > { %1224 = vmatprep.mubr.f32.mxu1 %v1772_v4  ;;  %v242_v50 = vsel %vm227_vm4, %v233_v44, %v235_v45 }
 0x10d   : > { %v237_v46 = vpop.permute.xlu0 %236 }
 0x10e   : > { %v239_v47 = vpop.permute.xlu1 %238  ;;  %v241_v48 = vsel %vm227_vm4, %v235_v45, %v237_v46 }
 0x10f   : > { %v243_v51 = vsel %vm227_vm4, %v239_v47, %v233_v44  ;;  %v240_v52 = vsel %vm227_vm4, %v237_v46, %v239_v47  ;;  %1722 = vmatprep.subr.msk.mxu0 %vm275_vm1, %v241_v48 }
 0x110   : > { %1725 = vmatprep.subr.msk.mxu1 %vm275_vm1, %v243_v51  ;;  %1723 = vmatpush1.msk.msra.mxu0 %vm275_vm1, %v242_v50 }
 0x111   : > { %1726 = vmatpush1.msk.msra.mxu1 %vm275_vm1, %v240_v52  ;;  %v245_v53 = vpop.permute.xlu0 %244  ;;  %1724 = vmatmul.mubr.msk.f32.vlgmr.msra.gmra.mxu0 %vm271_vm2, %v1721_v49 }
 0x112   : > { %v247_v54 = vpop.permute.xlu1 %246  ;;  %1316 = vmatprep.mubr.f32.mxu0 %v1772_v4  ;;  %1727 = vmatmul.mubr.msk.f32.vlgmr.msra.gmra.mxu1 %vm271_vm2, %v1721_v49 }
 0x113   : > { %1387 = vmatprep.mubr.f32.mxu1 %v1772_v4  ;;  %v254_v55 = vsel %vm227_vm4, %v245_v53, %v247_v54 }
 0x115   : > { %v249_v56 = vpop.permute.xlu0 %248 }
 0x116   : > { %v253_v57 = vsel %vm227_vm4, %v247_v54, %v249_v56  ;;  %v251_v58 = vpop.permute.xlu1 %250 }
 0x117   : > { %1729 = vmatprep.subr.msk.mxu0 %vm275_vm1, %v253_v57  ;;  %v252_v60 = vsel %vm227_vm4, %v249_v56, %v251_v58  ;;  %v255_v61 = vsel %vm227_vm4, %v251_v58, %v245_v53 }
 0x118   : > { %1730 = vmatpush1.msk.msra.mxu0 %vm275_vm1, %v254_v55  ;;  %1732 = vmatprep.subr.msk.mxu1 %vm275_vm1, %v255_v61 }
 0x119   : > { %1731 = vmatmul.mubr.msk.f32.vlgmr.msra.gmra.mxu0 %vm271_vm2, %v1728_v59  ;;  %1733 = vmatpush1.msk.msra.mxu1 %vm275_vm1, %v252_v60 }
 0x11a   : > { %1734 = vmatmul.mubr.msk.f32.vlgmr.msra.gmra.mxu1 %vm271_vm2, %v1728_v59  ;;  %1479 = vmatprep.mubr.f32.mxu0 %v1772_v4 }
 0x11b   : > { %1550 = vmatprep.mubr.f32.mxu1 %v1772_v4 }
 0x14a   : > { %v354_v8 = vpop.f32.mrf.mxu0 }
 0x14c   : > { %v356_v10 = vpop.f32.mrf.mxu0 }
 0x14d   : > { %v425_v9 = vpop.f32.mrf.mxu1 }
 0x14e   : > { %v507_v12 = vpop.f32.mrf.mxu0 }
 0x14f   : > { %v427_v11 = vpop.f32.mrf.mxu1  ;;  %v508_v25 = vadd.f32 %v507_v12, %v354_v8 }
 0x150   : > { %v509_v14 = vpop.f32.mrf.mxu0 }
 0x151   : > { %v510_v26 = vadd.f32 %v509_v14, %v356_v10 }
 0x152   : > { %v578_v13 = vpop.f32.mrf.mxu1 }
 0x153   : > { %v579_v28 = vadd.f32 %v578_v13, %v425_v9 }
 0x154   : > { %v580_v15 = vpop.f32.mrf.mxu1 }
 0x155   : > { %v666_v16 = vpop.f32.mrf.mxu0  ;;  %v581_v31 = vadd.f32 %v580_v15, %v427_v11 }
 0x156   : > { %v737_v17 = vpop.f32.mrf.mxu1  ;;  %v742_v30 = vadd.f32 %v666_v16, %v508_v25 }
 0x157   : > { %v668_v18 = vpop.f32.mrf.mxu0  ;;  %v744_v34 = vadd.f32 %v737_v17, %v579_v28 }
 0x158   : > { %v739_v19 = vpop.f32.mrf.mxu1  ;;  %v743_v32 = vadd.f32 %v668_v18, %v510_v26  ;;  %v1609_v18 = vld [vmem:[%s2048_s2] sm:$0xff] }
 0x159   : > { %v745_v37 = vadd.f32 %v739_v19, %v581_v31 }
 0x16e   : > { %v257_v62 = vpop.permute.xlu0 %256 }
 0x171   : > { %v259_v63 = vpop.permute.xlu1 %258 }
 0x172   : > { %v266_v0 = vsel %vm227_vm4, %v257_v62, %v259_v63  ;;  %v261_v1 = vpop.permute.xlu0 %260 }
 0x173   : > { %v265_v2 = vsel %vm227_vm4, %v259_v63, %v261_v1 }
 0x174   : > { %1736 = vmatprep.subr.msk.mxu0 %vm275_vm1, %v265_v2 }
 0x175   : > { %1737 = vmatpush1.msk.msra.mxu0 %vm275_vm1, %v266_v0  ;;  %v263_v5 = vpop.permute.xlu1 %262 }
 0x176   : > { %v264_v4 = vsel %vm227_vm4, %v261_v1, %v263_v5  ;;  %v267_v7 = vsel %vm227_vm4, %v263_v5, %v257_v62  ;;  %1738 = vmatmul.mubr.msk.f32.vlgmr.msra.gmra.mxu0 %vm271_vm2, %v1735_v3  ;;  %v1774_v62 = vmov 0  }
 0x177   : > { %1739 = vmatprep.subr.msk.mxu1 %vm275_vm1, %v267_v7  ;;  %1759 = vset.pattern.permute.xlu0 %v1774_v62 }
 0x178   : > { %1740 = vmatpush1.msk.msra.mxu1 %vm275_vm1, %v264_v4 }
 0x179   : > { %1741 = vmatmul.mubr.msk.f32.vlgmr.msra.gmra.mxu1 %vm271_vm2, %v1735_v3 }
 0x1c2   : > { %v829_v20 = vpop.f32.mrf.mxu0  ;;  %v900_v21 = vpop.f32.mrf.mxu1 }
 0x1c3   : > { %v905_v36 = vadd.f32 %v829_v20, %v742_v30  ;;  %v907_v40 = vadd.f32 %v900_v21, %v744_v34 }
 0x1c4   : > { %v831_v22 = vpop.f32.mrf.mxu0  ;;  %v902_v23 = vpop.f32.mrf.mxu1 }
 0x1c5   : > { %v906_v38 = vadd.f32 %v831_v22, %v743_v32  ;;  %v908_v43 = vadd.f32 %v902_v23, %v745_v37 }
 0x1c9   : > { %v992_v24 = vpop.f32.mrf.mxu0 }
 0x1ca   : > { %v1063_v27 = vpop.f32.mrf.mxu1  ;;  %v1068_v42 = vadd.f32 %v992_v24, %v905_v36 }
 0x1cb   : > { %v994_v29 = vpop.f32.mrf.mxu0  ;;  %v1070_v46 = vadd.f32 %v1063_v27, %v907_v40 }
 0x1cc   : > { %v1065_v33 = vpop.f32.mrf.mxu1  ;;  %v1069_v44 = vadd.f32 %v994_v29, %v906_v38 }
 0x1cd   : > { %v1071_v49 = vadd.f32 %v1065_v33, %v908_v43 }
 0x1d1   : > { %v1155_v35 = vpop.f32.mrf.mxu0 }
 0x1d2   : > { %v1226_v39 = vpop.f32.mrf.mxu1  ;;  %v1231_v48 = vadd.f32 %v1155_v35, %v1068_v42 }
 0x1d3   : > { %v1157_v41 = vpop.f32.mrf.mxu0  ;;  %v1233_v52 = vadd.f32 %v1226_v39, %v1070_v46 }
 0x1d4   : > { %v1228_v45 = vpop.f32.mrf.mxu1  ;;  %v1232_v50 = vadd.f32 %v1157_v41, %v1069_v44 }
 0x1d5   : > { %v1234_v55 = vadd.f32 %v1228_v45, %v1071_v49 }
 0x1d9   : > { %v1318_v47 = vpop.f32.mrf.mxu0 }
 0x1da   : > { %v1389_v51 = vpop.f32.mrf.mxu1  ;;  %v1394_v54 = vadd.f32 %v1318_v47, %v1231_v48 }
 0x1db   : > { %v1320_v53 = vpop.f32.mrf.mxu0  ;;  %v1396_v60 = vadd.f32 %v1389_v51, %v1233_v52 }
 0x1dc   : > { %v1395_v57 = vadd.f32 %v1320_v53, %v1232_v50  ;;  %v1391_v58 = vpop.f32.mrf.mxu1 }
 0x1dd   : > { %v1397_v1 = vadd.f32 %v1391_v58, %v1234_v55 }
 0x236   : > { %v1481_v56 = vpop.f32.mrf.mxu0 }
 0x237   : > { %v1557_v59 = vadd.f32 %v1481_v56, %v1394_v54 }
 0x238   : > { %v1483_v61 = vpop.f32.mrf.mxu0 }
 0x239   : > { %v1558_v63 = vadd.f32 %v1483_v61, %v1395_v57  ;;  %1561 = vrot.lane.b32.xlu0 %v1557_v59, %s1770_s18  ;;  %v1552_v0 = vpop.f32.mrf.mxu1 }
 0x23a   : > { %v1559_v2 = vadd.f32 %v1552_v0, %v1396_v60 }
 0x23b   : > { %1563 = vrot.lane.b32.xlu1 %v1558_v63, %s1770_s18  ;;  %v1554_v3 = vpop.f32.mrf.mxu1 }
 0x23c   : > { %v1560_v5 = vadd.f32 %v1554_v3, %v1397_v1 }
 0x23d   : > { %1565 = vrot.lane.b32.xlu0 %v1559_v2, %s1770_s18 }
 0x23f   : > { %1567 = vrot.lane.b32.xlu1 %v1560_v5, %s1770_s18 }
 0x2ab   : > { %v1562_v4 = vpop.permute.xlu0 %1561 }
 0x2ad   : > { %v1564_v7 = vpop.permute.xlu1 %1563 }
 0x2ae   : > { %v1571_v8 = vsel %vm189_vm0, %v1562_v4, %v1564_v7 }
 0x2af   : > { %v1573_v9 = vmax.f32 %v1557_v59, %v1571_v8  ;;  %v1566_v10 = vpop.permute.xlu0 %1565 }
 0x2b0   : > { %v1570_v11 = vsel %vm189_vm0, %v1564_v7, %v1566_v10 }
 0x2b1   : > { %v1574_v12 = vmax.f32 %v1558_v63, %v1570_v11  ;;  %1577 = vrot.lane.b32.xlu0 %v1573_v9, %s1771_s19  ;;  %v1568_v13 = vpop.permute.xlu1 %1567 }
 0x2b2   : > { %v1569_v14 = vsel %vm189_vm0, %v1566_v10, %v1568_v13  ;;  %v1572_v15 = vsel %vm189_vm0, %v1568_v13, %v1562_v4 }
 0x2b3   : > { %v1575_v16 = vmax.f32 %v1559_v2, %v1569_v14  ;;  %1579 = vrot.lane.b32.xlu1 %v1574_v12, %s1771_s19  ;;  %v1576_v17 = vmax.f32 %v1560_v5, %v1572_v15 }
 0x2b5   : > { %1581 = vrot.lane.b32.xlu0 %v1575_v16, %s1771_s19 }
 0x2b7   : > { %1583 = vrot.lane.b32.xlu1 %v1576_v17, %s1771_s19 }
 0x2b9   : > { %1612 = vperm.xlu0 %1759, %v1609_v18  }
 0x323   : > { %v1578_v19 = vpop.permute.xlu0 %1577 }
 0x325   : > { %v1580_v20 = vpop.permute.xlu1 %1579 }
 0x326   : > { %v1587_v21 = vsel %vm202_vm3, %v1578_v19, %v1580_v20 }
 0x327   : > { %v1589_v22 = vmax.f32 %v1573_v9, %v1587_v21  ;;  %v1582_v23 = vpop.permute.xlu0 %1581 }
 0x328   : > { %v1586_v24 = vsel %vm202_vm3, %v1580_v20, %v1582_v23 }
 0x329   : > { %1593 = vrot.lane.b32.xlu1 %v1589_v22, %s1773_s24  ;;  %v1584_v25 = vpop.permute.xlu1 %1583  ;;  %v1590_v27 = vmax.f32 %v1574_v12, %v1586_v24 }
 0x32a   : > { %v1585_v26 = vsel %vm202_vm3, %v1582_v23, %v1584_v25  ;;  %v1588_v29 = vsel %vm202_vm3, %v1584_v25, %v1578_v19 }
 0x32b   : > { %v1591_v28 = vmax.f32 %v1575_v16, %v1585_v26  ;;  %v1592_v30 = vmax.f32 %v1576_v17, %v1588_v29 }
 0x32d   : > { %1595 = vrot.lane.b32.xlu1 %v1590_v27, %s1773_s24  ;;  %1597 = vrot.lane.b32.xlu0 %v1591_v28, %s1773_s24 }
 0x331   : > { %1599 = vrot.lane.b32.xlu1 %v1592_v30, %s1773_s24 }
 0x334   : > { %v1613_v31 = vpop.permute.xlu0 %1612 }
 0x39b   : > { %v1594_v32 = vpop.permute.xlu1 %1593 }
 0x39f   : > { %v1598_v33 = vpop.permute.xlu0 %1597  ;;  %v1596_v34 = vpop.permute.xlu1 %1595 }
 0x3a0   : > { %v1602_v35 = vsel %vm227_vm4, %v1596_v34, %v1598_v33  ;;  %v1603_v36 = vsel %vm227_vm4, %v1594_v32, %v1596_v34 }
 0x3a1   : > { %v1605_v37 = vmax.f32 %v1589_v22, %v1603_v36  ;;  %v1606_v38 = vmax.f32 %v1590_v27, %v1602_v35 }
 0x3a3   : > { %v1615_v39 = vadd.f32 %v1613_v31, %v1605_v37  ;;  %v1616_v40 = vadd.f32 %v1613_v31, %v1606_v38  ;;  %v1600_v41 = vpop.permute.xlu1 %1599 }
 0x3a4   : > { %v1601_v42 = vsel %vm227_vm4, %v1598_v33, %v1600_v41  ;;  %v1604_v43 = vsel %vm227_vm4, %v1600_v41, %v1594_v32 }
 0x3a5   : > { %1619 = vst [vmem:[%s170_s17] sm:$0xff] %v1615_v39  ;;  %1620 = vst [vmem:[%s170_s17 + $0x8] sm:$0xff] %v1616_v40  ;;  %v1607_v44 = vmax.f32 %v1591_v28, %v1601_v42  ;;  %v1608_v45 = vmax.f32 %v1592_v30, %v1604_v43 }
 0x3a7   : > { %v1617_v46 = vadd.f32 %v1613_v31, %v1607_v44  ;;  %v1618_v47 = vadd.f32 %v1613_v31, %v1608_v45 }
 0x3a9   : > { %1621 = vst [vmem:[%s170_s17 + $0x10] sm:$0xff] %v1617_v46  ;;  %1622 = vst [vmem:[%s170_s17 + $0x18] sm:$0xff] %v1618_v47 }
 0x3aa PF: > { %s13_s12 = sadd.s32 1, %s1768_s12  }
 0x3ab   : > { %p10_p4 = scmp.ge.s32.totalorder %s13_s12, 4  }
 0x3ad   :  { %12 = sbr.rel (!%p10_p4) target bundleno = 1 (0x1), region = 69 }

</bundles_post_ra>
